<compile_context>
chip_gen: v6e
topology: v6e:2x2x1
jax: 0.10.0
libtpu: 0.0.40
codegen_flags: <defaults>
</compile_context>

<pallas_src>
import jax
import jax.numpy as jnp
import numpy as np
from jax.experimental import pallas as pl
from jax.experimental.pallas import tpu as pltpu


# --------------------------------------------------------------------------
# VMEM budgeting
# --------------------------------------------------------------------------
def _vmem_capacity_bytes() -> int:
    """Physical VMEM per TensorCore; conservative fallback if query fails."""
    try:
        return int(pltpu.get_tpu_info().vmem_capacity_bytes)
    except Exception:
        return 64 * 1024 * 1024            # v7x-sized worst case


def _pick_channel_tile(C, HWp, Cout, K, compute_itemsize, budget_bytes):
    """Largest channel tile dividing C whose working set fits the VMEM budget.

    Prefers TC == C so the channel-reduction grid axis disappears entirely."""
    def footprint(tc):
        xbuf = 2 * tc * HWp * compute_itemsize          # double-buffered x tile
        temps = 4 * tc * HWp * 4                        # rolled/masked temporaries
        outbuf = 2 * Cout * HWp * 4                     # resident output block
        wbuf = 2 * (C * (K * K + 1) + Cout * C + Cout) * 4   # resident weights
        mbuf = 2 * (K * K) * HWp * 4                    # resident border masks
        return xbuf + temps + outbuf + wbuf + mbuf

    if footprint(C) <= budget_bytes:
        return C
    cands = [t for t in range(8 * (C // 8), 0, -8) if C % t == 0]
    for tc in cands:
        if footprint(tc) <= budget_bytes:
            return tc
    return cands[-1] if cands else C


# --------------------------------------------------------------------------
# Kernel
# --------------------------------------------------------------------------
def make_dsconv_kernel(W, HWp, K, n_c, compute_dtype):
    half = K // 2
    center = half * K + half

    def kernel(x_ref, wdw_ref, b1_ref, wpw_ref, b2_ref, mask_ref, o_ref):
        c_idx = pl.program_id(1)

        x = x_ref[0].astype(compute_dtype)                     # (TC, HWp)

        # Weights are fully resident in VMEM (constant index_map); pick the
        # current channel tile by indexing the leading n_c axis.
        taps = wdw_ref[c_idx].astype(compute_dtype)            # (TC, K*K)
        b1 = b1_ref[c_idx].astype(compute_dtype)               # (TC, 1)
        wpw = wpw_ref[c_idx].astype(compute_dtype)             # (Cout, TC)

        # ---- depthwise KxK conv: lane rolls (XLU) + masked FMAs (VPU) ----
        # Centre tap + BN1 shift initialise the accumulator (saves two full
        # (TC, HWp) passes vs. zeros-init + separate bias add).
        acc = x * taps[:, center:center + 1] + b1
        for kh in range(K):
            for kw in range(K):
                j = kh * K + kw
                if j == center:
                    continue
                d = (kh - half) * W + (kw - half)               # flat-lane offset
                shifted = x if d == 0 else pltpu.roll(x, shift=(-d) % HWp, axis=1)
                m = mask_ref[j:j + 1, :].astype(compute_dtype)  # (1, HWp) border mask
                acc = acc + (shifted * m) * taps[:, j:j + 1]

        # ---- BN1 scale folded into taps; ReLU6 ----
        y = jnp.clip(acc, 0.0, 6.0).astype(compute_dtype)

        # ---- pointwise 1x1 conv on the MXU: (Cout, TC) @ (TC, HWp) ----
        partial = jnp.dot(wpw, y, preferred_element_type=jnp.float32)

        b2 = b2_ref[...].astype(jnp.float32)                    # (Cout, 1)

        if n_c == 1:
            # Single channel tile: no accumulation needed.
            o_ref[0] = (partial + b2).astype(o_ref.dtype)
        else:
            # Accumulate directly into the resident (f32) output block.
            @pl.when(c_idx == 0)
            def _():
                o_ref[0] = (partial + b2).astype(o_ref.dtype)

            @pl.when(c_idx != 0)
            def _():
                o_ref[0] = o_ref[0] + partial.astype(o_ref.dtype)

    return kernel


# --------------------------------------------------------------------------
# Wrapper
# --------------------------------------------------------------------------
def dsconv_pallas(x_nchw, w_dw, w_pw, bn1, bn2, eps=1e-5,
                  compute_dtype=jnp.float32, channel_tile=None):
    """x_nchw: (N, C, H, W).
       w_dw: (C, 1, K, K) torch-layout depthwise weight.
       w_pw: (Cout, C, 1, 1) torch-layout pointwise weight.
       bn1/bn2: dict(gamma, beta, mean, var).
       compute_dtype: jnp.float32 (default) or jnp.bfloat16 on v6e/v7x."""
    N, C, H, W = x_nchw.shape
    Cout = w_pw.shape[0]
    K = w_dw.shape[-1]
    HW = H * W
    HWp = ((HW + 127) // 128) * 128        # lane-dense, unmasked stores

    # ---- BN folding (done once, plain JAX) ----
    s1 = bn1["gamma"] / jnp.sqrt(bn1["var"] + eps)                     # (C,)
    b1 = (bn1["beta"] - bn1["mean"] * s1).reshape(C, 1).astype(jnp.float32)
    s2 = bn2["gamma"] / jnp.sqrt(bn2["var"] + eps)                     # (Cout,)
    b2 = (bn2["beta"] - bn2["mean"] * s2).reshape(Cout, 1).astype(jnp.float32)

    # Depthwise taps with BN1 scale folded in: (C, K*K).
    wdw = (w_dw[:, 0, :, :].reshape(C, K * K) * s1[:, None]).astype(compute_dtype)
    # Pointwise weight with BN2 scale folded in: (Cout, C).
    wpw = (w_pw[:, :, 0, 0] * s2[:, None]).astype(compute_dtype)

    # ---- VMEM-aware channel tile (prefer TC == C) ----
    cap = _vmem_capacity_bytes()
    vmem_limit = min(int(cap * 0.9), 128 * 1024 * 1024)
    budget = int(cap * 0.7)
    itemsize = jnp.dtype(compute_dtype).itemsize
    TC = channel_tile if channel_tile is not None else _pick_channel_tile(
        C, HWp, Cout, K, itemsize, budget)
    assert C % TC == 0, (C, TC)
    n_c = C // TC

    # Pre-tile weights along the channel axis so the kernel indexes [c_idx]
    # (no dynamic sublane/lane slicing needed).
    wdw_r = wdw.reshape(n_c, TC, K * K)
    b1_r = b1.reshape(n_c, TC, 1)
    wpw_r = wpw.reshape(Cout, n_c, TC).transpose(1, 0, 2)       # (n_c, Cout, TC)

    # Flattened-spatial layout (pure reshape); pad lanes to a multiple of 128.
    x_flat = x_nchw.reshape(N, C, HW).astype(compute_dtype)
    if HWp != HW:
        x_flat = jnp.pad(x_flat, ((0, 0), (0, 0), (0, HWp - HW)))

    # Precomputed border masks, one (1, HWp) row per tap (pad lanes -> 0).
    half = K // 2
    row = jnp.repeat(jnp.arange(H, dtype=jnp.int32), W)         # (HW,)
    col = jnp.tile(jnp.arange(W, dtype=jnp.int32), H)           # (HW,)
    mrows = []
    for kh in range(K):
        for kw in range(K):
            dh, dw = kh - half, kw - half
            ok = ((row + dh >= 0) & (row + dh < H) &
                  (col + dw >= 0) & (col + dw < W))
            mrows.append(ok)
    mask = jnp.stack(mrows, 0).astype(compute_dtype)            # (K*K, HW)
    if HWp != HW:
        mask = jnp.pad(mask, ((0, 0), (0, HWp - HW)))

    # f32 output only when accumulating partials over channel tiles.
    out_dtype = x_nchw.dtype if n_c == 1 else jnp.float32

    kernel = make_dsconv_kernel(W, HWp, K, n_c, compute_dtype)

    out_flat = pl.pallas_call(
        kernel,
        out_shape=jax.ShapeDtypeStruct((N, Cout, HWp), out_dtype),
        grid_spec=pltpu.PrefetchScalarGridSpec(
            num_scalar_prefetch=0,
            grid=(N, n_c),
            in_specs=[
                pl.BlockSpec((1, TC, HWp), lambda n, c: (n, c, 0)),       # x tile
                pl.BlockSpec((n_c, TC, K * K), lambda n, c: (0, 0, 0)),   # dw taps (resident)
                pl.BlockSpec((n_c, TC, 1), lambda n, c: (0, 0, 0)),       # bn1 shift (resident)
                pl.BlockSpec((n_c, Cout, TC), lambda n, c: (0, 0, 0)),    # pw weight (resident)
                pl.BlockSpec((Cout, 1), lambda n, c: (0, 0)),             # bn2 shift (resident)
                pl.BlockSpec((K * K, HWp), lambda n, c: (0, 0)),          # border masks (resident)
            ],
            out_specs=pl.BlockSpec((1, Cout, HWp), lambda n, c: (n, 0, 0)),
        ),
        compiler_params=pltpu.CompilerParams(
            dimension_semantics=("parallel", "arbitrary"),
            vmem_limit_bytes=vmem_limit),
    )(x_flat, wdw_r, b1_r, wpw_r, b2, mask)

    out = out_flat[:, :, :HW] if HWp != HW else out_flat
    return out.reshape(N, Cout, H, W).astype(x_nchw.dtype)


# --------------------------------------------------------------------------
# Pure-JAX reference (lax conv) for correctness check
# --------------------------------------------------------------------------
def dsconv_reference(x_nchw, w_dw, w_pw, bn1, bn2, eps=1e-5):
    C = x_nchw.shape[1]
    p = w_dw.shape[-1] // 2
    y = jax.lax.conv_general_dilated(
        x_nchw, w_dw, window_strides=(1, 1), padding=((p, p), (p, p)),
        feature_group_count=C,
        dimension_numbers=("NCHW", "OIHW", "NCHW"))
    s1 = bn1["gamma"] / jnp.sqrt(bn1["var"] + eps)
    y = y * s1[None, :, None, None] + (bn1["beta"] - bn1["mean"] * s1)[None, :, None, None]
    y = jnp.clip(y, 0.0, 6.0)
    y = jax.lax.conv_general_dilated(
        y, w_pw, window_strides=(1, 1), padding=((0, 0), (0, 0)),
        dimension_numbers=("NCHW", "OIHW", "NCHW"))
    s2 = bn2["gamma"] / jnp.sqrt(bn2["var"] + eps)
    y = y * s2[None, :, None, None] + (bn2["beta"] - bn2["mean"] * s2)[None, :, None, None]
    return y


# --------------------------------------------------------------------------
# Self-test
# --------------------------------------------------------------------------
if __name__ == "__main__":
    def make_case(key, N, C, H, W, Cout, K=3):
        keys = jax.random.split(key, 8)
        x = jax.random.normal(keys[0], (N, C, H, W), jnp.float32)
        w_dw = jax.random.normal(keys[1], (C, 1, K, K), jnp.float32) * 0.2
        w_pw = jax.random.normal(keys[2], (Cout, C, 1, 1), jnp.float32) * 0.2
        bn1 = dict(
            gamma=1.0 + 0.1 * jax.random.normal(keys[3], (C,), jnp.float32),
            beta=0.1 * jax.random.normal(keys[4], (C,), jnp.float32),
            mean=0.05 * jax.random.normal(keys[5], (C,), jnp.float32),
            var=jnp.abs(1.0 + 0.1 * jax.random.normal(keys[6], (C,), jnp.float32)),
        )
        bn2 = dict(
            gamma=1.0 + 0.1 * jax.random.normal(keys[7], (Cout,), jnp.float32),
            beta=jnp.linspace(-0.1, 0.1, Cout, dtype=jnp.float32),
            mean=jnp.linspace(-0.05, 0.05, Cout, dtype=jnp.float32),
            var=jnp.linspace(0.9, 1.1, Cout, dtype=jnp.float32),
        )
        return x, w_dw, w_pw, bn1, bn2

    k1, k2, k3 = jax.random.split(jax.random.PRNGKey(0), 3)

    # Case 1: primary small shape (H*W already a multiple of 128).
    x, w_dw, w_pw, bn1, bn2 = make_case(k1, 2, 4, 16, 16, 8)
    out = jax.block_until_ready(dsconv_pallas(x, w_dw, w_pw, bn1, bn2))
    ref = jax.block_until_ready(dsconv_reference(x, w_dw, w_pw, bn1, bn2))
    assert out.shape == (2, 8, 16, 16), out.shape
    np.testing.assert_allclose(np.asarray(out), np.asarray(ref), rtol=1e-4, atol=1e-4)

    # Case 2: 7x7 stage -> H*W = 49 padded to 128 lanes (lane-dense stores).
    x, w_dw, w_pw, bn1, bn2 = make_case(k2, 1, 8, 7, 7, 16)
    out = jax.block_until_ready(dsconv_pallas(x, w_dw, w_pw, bn1, bn2))
    ref = jax.block_until_ready(dsconv_reference(x, w_dw, w_pw, bn1, bn2))
    np.testing.assert_allclose(np.asarray(out), np.asarray(ref), rtol=1e-4, atol=1e-4)

    # Case 3: forced channel tiling (n_c > 1) exercises accumulation directly
    # into the resident output block and in-kernel weight-tile selection.
    x, w_dw, w_pw, bn1, bn2 = make_case(k3, 1, 32, 8, 8, 16)
    out = jax.block_until_ready(
        dsconv_pallas(x, w_dw, w_pw, bn1, bn2, channel_tile=16))
    ref = jax.block_until_ready(dsconv_reference(x, w_dw, w_pw, bn1, bn2))
    np.testing.assert_allclose(np.asarray(out), np.asarray(ref), rtol=1e-4, atol=1e-4)

    print("KERNEL_OK")
</pallas_src>

<mosaic_0001>
module attributes {stable_mosaic.version = 11 : i64} {
  func.func @kernel(%arg0: i32, %arg1: i32, %arg2: memref<1x4x256xf32, #tpu.memory_space<vmem>>, %arg3: memref<1x4x9xf32, #tpu.memory_space<vmem>>, %arg4: memref<1x4x1xf32, #tpu.memory_space<vmem>>, %arg5: memref<1x8x4xf32, #tpu.memory_space<vmem>>, %arg6: memref<8x1xf32, #tpu.memory_space<vmem>>, %arg7: memref<9x256xf32, #tpu.memory_space<vmem>>, %arg8: memref<1x8x256xf32, #tpu.memory_space<vmem>>) attributes {dimension_semantics = [#tpu.dimension_semantics<parallel>, #tpu.dimension_semantics<arbitrary>], iteration_bounds = array<i64: 2, 1>, scalar_prefetch = 0 : i64, scratch_operands = 0 : i64, tpu.core_type = #tpu.core_type<tc>, window_params = [{transform_indices = @transform_0, window_bounds = array<i64: 1, 4, 256>}, {pipeline_mode = #tpu.pipeline_mode<synchronous>, transform_indices = @transform_1, window_bounds = array<i64: 1, 4, 9>}, {pipeline_mode = #tpu.pipeline_mode<synchronous>, transform_indices = @transform_2, window_bounds = array<i64: 1, 4, 1>}, {pipeline_mode = #tpu.pipeline_mode<synchronous>, transform_indices = @transform_3, window_bounds = array<i64: 1, 8, 4>}, {pipeline_mode = #tpu.pipeline_mode<synchronous>, transform_indices = @transform_4, window_bounds = array<i64: 8, 1>}, {pipeline_mode = #tpu.pipeline_mode<synchronous>, transform_indices = @transform_5, window_bounds = array<i64: 9, 256>}, {transform_indices = @transform_6, window_bounds = array<i64: 1, 8, 256>}]} {
    %c0 = arith.constant 0 : index
    %c0_0 = arith.constant 0 : index
    %c0_1 = arith.constant 0 : index
    %0 = vector.load %arg2[%c0, %c0_0, %c0_1] : memref<1x4x256xf32, #tpu.memory_space<vmem>>, vector<1x4x256xf32>
    %1 = vector.shape_cast %0 : vector<1x4x256xf32> to vector<4x256xf32>
    %2 = arith.index_cast %arg1 : i32 to index
    %c0_2 = arith.constant 0 : index
    %c0_3 = arith.constant 0 : index
    %3 = vector.load %arg3[%2, %c0_2, %c0_3] : memref<1x4x9xf32, #tpu.memory_space<vmem>>, vector<1x4x9xf32>
    %4 = vector.shape_cast %3 : vector<1x4x9xf32> to vector<4x9xf32>
    %5 = arith.index_cast %arg1 : i32 to index
    %c0_4 = arith.constant 0 : index
    %c0_5 = arith.constant 0 : index
    %6 = vector.load %arg4[%5, %c0_4, %c0_5] : memref<1x4x1xf32, #tpu.memory_space<vmem>>, vector<1x4x1xf32>
    %7 = vector.shape_cast %6 : vector<1x4x1xf32> to vector<4x1xf32>
    %8 = arith.index_cast %arg1 : i32 to index
    %c0_6 = arith.constant 0 : index
    %c0_7 = arith.constant 0 : index
    %9 = vector.load %arg5[%8, %c0_6, %c0_7] : memref<1x8x4xf32, #tpu.memory_space<vmem>>, vector<1x8x4xf32>
    %10 = vector.shape_cast %9 : vector<1x8x4xf32> to vector<8x4xf32>
    %11 = vector.extract_strided_slice %4 {offsets = [0, 4], sizes = [4, 1], strides = [1, 1]} : vector<4x9xf32> to vector<4x1xf32>
    %12 = vector.broadcast %11 : vector<4x1xf32> to vector<4x256xf32>
    %13 = arith.mulf %1, %12 : vector<4x256xf32>
    %14 = vector.broadcast %7 : vector<4x1xf32> to vector<4x256xf32>
    %15 = arith.addf %13, %14 : vector<4x256xf32>
    %c17_i32 = arith.constant 17 : i32
    %16 = tpu.dynamic_rotate %1 by %c17_i32 dim 1 : vector<4x256xf32>, i32 -> vector<4x256xf32>
    %c0_8 = arith.constant 0 : index
    %c0_9 = arith.constant 0 : index
    %17 = vector.load %arg7[%c0_8, %c0_9] : memref<9x256xf32, #tpu.memory_space<vmem>>, vector<1x256xf32>
    %18 = vector.broadcast %17 : vector<1x256xf32> to vector<4x256xf32>
    %19 = arith.mulf %16, %18 : vector<4x256xf32>
    %20 = vector.extract_strided_slice %4 {offsets = [0, 0], sizes = [4, 1], strides = [1, 1]} : vector<4x9xf32> to vector<4x1xf32>
    %21 = vector.broadcast %20 : vector<4x1xf32> to vector<4x256xf32>
    %22 = arith.mulf %19, %21 : vector<4x256xf32>
    %23 = arith.addf %15, %22 : vector<4x256xf32>
    %c16_i32 = arith.constant 16 : i32
    %24 = tpu.dynamic_rotate %1 by %c16_i32 dim 1 : vector<4x256xf32>, i32 -> vector<4x256xf32>
    %c1 = arith.constant 1 : index
    %c0_10 = arith.constant 0 : index
    %25 = vector.load %arg7[%c1, %c0_10] : memref<9x256xf32, #tpu.memory_space<vmem>>, vector<1x256xf32>
    %26 = vector.broadcast %25 : vector<1x256xf32> to vector<4x256xf32>
    %27 = arith.mulf %24, %26 : vector<4x256xf32>
    %28 = vector.extract_strided_slice %4 {offsets = [0, 1], sizes = [4, 1], strides = [1, 1]} : vector<4x9xf32> to vector<4x1xf32>
    %29 = vector.broadcast %28 : vector<4x1xf32> to vector<4x256xf32>
    %30 = arith.mulf %27, %29 : vector<4x256xf32>
    %31 = arith.addf %23, %30 : vector<4x256xf32>
    %c15_i32 = arith.constant 15 : i32
    %32 = tpu.dynamic_rotate %1 by %c15_i32 dim 1 : vector<4x256xf32>, i32 -> vector<4x256xf32>
    %c2 = arith.constant 2 : index
    %c0_11 = arith.constant 0 : index
    %33 = vector.load %arg7[%c2, %c0_11] : memref<9x256xf32, #tpu.memory_space<vmem>>, vector<1x256xf32>
    %34 = vector.broadcast %33 : vector<1x256xf32> to vector<4x256xf32>
    %35 = arith.mulf %32, %34 : vector<4x256xf32>
    %36 = vector.extract_strided_slice %4 {offsets = [0, 2], sizes = [4, 1], strides = [1, 1]} : vector<4x9xf32> to vector<4x1xf32>
    %37 = vector.broadcast %36 : vector<4x1xf32> to vector<4x256xf32>
    %38 = arith.mulf %35, %37 : vector<4x256xf32>
    %39 = arith.addf %31, %38 : vector<4x256xf32>
    %c1_i32 = arith.constant 1 : i32
    %40 = tpu.dynamic_rotate %1 by %c1_i32 dim 1 : vector<4x256xf32>, i32 -> vector<4x256xf32>
    %c3 = arith.constant 3 : index
    %c0_12 = arith.constant 0 : index
    %41 = vector.load %arg7[%c3, %c0_12] : memref<9x256xf32, #tpu.memory_space<vmem>>, vector<1x256xf32>
    %42 = vector.broadcast %41 : vector<1x256xf32> to vector<4x256xf32>
    %43 = arith.mulf %40, %42 : vector<4x256xf32>
    %44 = vector.extract_strided_slice %4 {offsets = [0, 3], sizes = [4, 1], strides = [1, 1]} : vector<4x9xf32> to vector<4x1xf32>
    %45 = vector.broadcast %44 : vector<4x1xf32> to vector<4x256xf32>
    %46 = arith.mulf %43, %45 : vector<4x256xf32>
    %47 = arith.addf %39, %46 : vector<4x256xf32>
    %c255_i32 = arith.constant 255 : i32
    %48 = tpu.dynamic_rotate %1 by %c255_i32 dim 1 : vector<4x256xf32>, i32 -> vector<4x256xf32>
    %c5 = arith.constant 5 : index
    %c0_13 = arith.constant 0 : index
    %49 = vector.load %arg7[%c5, %c0_13] : memref<9x256xf32, #tpu.memory_space<vmem>>, vector<1x256xf32>
    %50 = vector.broadcast %49 : vector<1x256xf32> to vector<4x256xf32>
    %51 = arith.mulf %48, %50 : vector<4x256xf32>
    %52 = vector.extract_strided_slice %4 {offsets = [0, 5], sizes = [4, 1], strides = [1, 1]} : vector<4x9xf32> to vector<4x1xf32>
    %53 = vector.broadcast %52 : vector<4x1xf32> to vector<4x256xf32>
    %54 = arith.mulf %51, %53 : vector<4x256xf32>
    %55 = arith.addf %47, %54 : vector<4x256xf32>
    %c241_i32 = arith.constant 241 : i32
    %56 = tpu.dynamic_rotate %1 by %c241_i32 dim 1 : vector<4x256xf32>, i32 -> vector<4x256xf32>
    %c6 = arith.constant 6 : index
    %c0_14 = arith.constant 0 : index
    %57 = vector.load %arg7[%c6, %c0_14] : memref<9x256xf32, #tpu.memory_space<vmem>>, vector<1x256xf32>
    %58 = vector.broadcast %57 : vector<1x256xf32> to vector<4x256xf32>
    %59 = arith.mulf %56, %58 : vector<4x256xf32>
    %60 = vector.extract_strided_slice %4 {offsets = [0, 6], sizes = [4, 1], strides = [1, 1]} : vector<4x9xf32> to vector<4x1xf32>
    %61 = vector.broadcast %60 : vector<4x1xf32> to vector<4x256xf32>
    %62 = arith.mulf %59, %61 : vector<4x256xf32>
    %63 = arith.addf %55, %62 : vector<4x256xf32>
    %c240_i32 = arith.constant 240 : i32
    %64 = tpu.dynamic_rotate %1 by %c240_i32 dim 1 : vector<4x256xf32>, i32 -> vector<4x256xf32>
    %c7 = arith.constant 7 : index
    %c0_15 = arith.constant 0 : index
    %65 = vector.load %arg7[%c7, %c0_15] : memref<9x256xf32, #tpu.memory_space<vmem>>, vector<1x256xf32>
    %66 = vector.broadcast %65 : vector<1x256xf32> to vector<4x256xf32>
    %67 = arith.mulf %64, %66 : vector<4x256xf32>
    %68 = vector.extract_strided_slice %4 {offsets = [0, 7], sizes = [4, 1], strides = [1, 1]} : vector<4x9xf32> to vector<4x1xf32>
    %69 = vector.broadcast %68 : vector<4x1xf32> to vector<4x256xf32>
    %70 = arith.mulf %67, %69 : vector<4x256xf32>
    %71 = arith.addf %63, %70 : vector<4x256xf32>
    %c239_i32 = arith.constant 239 : i32
    %72 = tpu.dynamic_rotate %1 by %c239_i32 dim 1 : vector<4x256xf32>, i32 -> vector<4x256xf32>
    %c8 = arith.constant 8 : index
    %c0_16 = arith.constant 0 : index
    %73 = vector.load %arg7[%c8, %c0_16] : memref<9x256xf32, #tpu.memory_space<vmem>>, vector<1x256xf32>
    %74 = vector.broadcast %73 : vector<1x256xf32> to vector<4x256xf32>
    %75 = arith.mulf %72, %74 : vector<4x256xf32>
    %76 = vector.extract_strided_slice %4 {offsets = [0, 8], sizes = [4, 1], strides = [1, 1]} : vector<4x9xf32> to vector<4x1xf32>
    %77 = vector.broadcast %76 : vector<4x1xf32> to vector<4x256xf32>
    %78 = arith.mulf %75, %77 : vector<4x256xf32>
    %79 = arith.addf %71, %78 : vector<4x256xf32>
    %cst = arith.constant 0.000000e+00 : f32
    %cst_17 = arith.constant 6.000000e+00 : f32
    %80 = vector.broadcast %cst : f32 to vector<4x256xf32>
    %81 = arith.maximumf %80, %79 : vector<4x256xf32>
    %82 = vector.broadcast %cst_17 : f32 to vector<4x256xf32>
    %83 = arith.minimumf %82, %81 : vector<4x256xf32>
    %cst_18 = arith.constant dense<0.000000e+00> : vector<8x256xf32>
    %84 = tpu.matmul %10, %83, %cst_18 {dimension_numbers = #tpu.dot_dimension_numbers<[1], [0], [0], [1], [0, 0, 1, 1], [], []>} : vector<8x4xf32>, vector<4x256xf32>, vector<8x256xf32> -> vector<8x256xf32>
    %c0_19 = arith.constant 0 : index
    %c0_20 = arith.constant 0 : index
    %85 = vector.load %arg6[%c0_19, %c0_20] : memref<8x1xf32, #tpu.memory_space<vmem>>, vector<8x1xf32>
    %86 = vector.broadcast %85 : vector<8x1xf32> to vector<8x256xf32>
    %87 = arith.addf %84, %86 : vector<8x256xf32>
    %c0_21 = arith.constant 0 : index
    %c0_22 = arith.constant 0 : index
    %c0_23 = arith.constant 0 : index
    %88 = vector.load %arg8[%c0_21, %c0_22, %c0_23] : memref<1x8x256xf32, #tpu.memory_space<vmem>>, vector<1x8x256xf32>
    %89 = vector.shape_cast %88 : vector<1x8x256xf32> to vector<8x256xf32>
    %90 = vector.shape_cast %87 : vector<8x256xf32> to vector<1x8x256xf32>
    tpu.vector_store %arg8[%c0_21, %c0_22, %c0_23], %90 {strides = array<i32>} : memref<1x8x256xf32, #tpu.memory_space<vmem>>, vector<1x8x256xf32>,
    return
  }
  func.func @transform_0(%arg0: i32, %arg1: i32) -> (i32, i32, i32) {
    %c0_i32 = arith.constant 0 : i32
    %c0_i32_0 = arith.constant 0 : i32
    return %arg0, %arg1, %c0_i32 : i32, i32, i32
  }
  func.func @transform_1(%arg0: i32, %arg1: i32) -> (i32, i32, i32) {
    %c0_i32 = arith.constant 0 : i32
    %c0_i32_0 = arith.constant 0 : i32
    %c0_i32_1 = arith.constant 0 : i32
    %c0_i32_2 = arith.constant 0 : i32
    return %c0_i32, %c0_i32_0, %c0_i32_1 : i32, i32, i32
  }
  func.func @transform_2(%arg0: i32, %arg1: i32) -> (i32, i32, i32) {
    %c0_i32 = arith.constant 0 : i32
    %c0_i32_0 = arith.constant 0 : i32
    %c0_i32_1 = arith.constant 0 : i32
    %c0_i32_2 = arith.constant 0 : i32
    return %c0_i32, %c0_i32_0, %c0_i32_1 : i32, i32, i32
  }
  func.func @transform_3(%arg0: i32, %arg1: i32) -> (i32, i32, i32) {
    %c0_i32 = arith.constant 0 : i32
    %c0_i32_0 = arith.constant 0 : i32
    %c0_i32_1 = arith.constant 0 : i32
    %c0_i32_2 = arith.constant 0 : i32
    return %c0_i32, %c0_i32_0, %c0_i32_1 : i32, i32, i32
  }
  func.func @transform_4(%arg0: i32, %arg1: i32) -> (i32, i32) {
    %c0_i32 = arith.constant 0 : i32
    %c0_i32_0 = arith.constant 0 : i32
    %c0_i32_1 = arith.constant 0 : i32
    return %c0_i32, %c0_i32_0 : i32, i32
  }
  func.func @transform_5(%arg0: i32, %arg1: i32) -> (i32, i32) {
    %c0_i32 = arith.constant 0 : i32
    %c0_i32_0 = arith.constant 0 : i32
    %c0_i32_1 = arith.constant 0 : i32
    return %c0_i32, %c0_i32_0 : i32, i32
  }
  func.func @transform_6(%arg0: i32, %arg1: i32) -> (i32, i32, i32) {
    %c0_i32 = arith.constant 0 : i32
    %c0_i32_0 = arith.constant 0 : i32
    %c0_i32_1 = arith.constant 0 : i32
    return %arg0, %c0_i32, %c0_i32_0 : i32, i32, i32
  }
}

</mosaic_0001>

<bundles_post_ra>
// kernel: tpu_custom_call.1
= control target key start
LH: loop header
LB: loop body
LE: loop exit
PB: predicated region body
PF: predicated region fallthrough
CT: control target
= control target key end

     0   :  { %s1388_s0 = inlined_call_operand.hbm [shape: f32[2,4,256], index: 0, kind: input, shape index: {}]   ;;  %s1389_s1 = inlined_call_operand.hbm [shape: f32[1,4,9], index: 1, kind: input, shape index: {}]   ;;  %s1390_s2 = inlined_call_operand.vmem [shape: f32[1,4,1], index: 2, kind: input, shape index: {}]   ;;  %s1391_s3 = inlined_call_operand.vmem [shape: f32[1,8,4], index: 3, kind: input, shape index: {}]   ;;  %s1392_s4 = inlined_call_operand.vmem [shape: f32[8,1], index: 4, kind: input, shape index: {}]   ;;  %s1393_s5 = inlined_call_operand.vmem [shape: f32[9,256], index: 5, kind: input, shape index: {}]   ;;  %s1394_s6 = inlined_call_operand.hbm [shape: f32[2,8,256], index: 6, kind: output, shape index: {}]  }
   0x1   :  { %1397 = sst [smem:[#allocation12_spill]] %s1389_s1 }
   0x2   :  { %11 = vsyncpa [#allocation3], 0 }
   0x3   :  { %13 = vsyncpa [#allocation3 + $0x1], 0 }
   0x4   :  { %14 = vsyncpa [#allocation6], 0 }
   0x5   :  { %15 = vsyncpa [#allocation4], 0 }
   0x6   :  { %17 = vsyncpa [#allocation4 + $0x1], 0  ;;  %s1134_s21 = smov 0   ;;  %s1136_s22 = smov 0  }
   0x7   :  { %s1138_s23 = smov 0   ;;  %s1140_s24 = smov 0  }
   0x8   :  { %s1142_s25 = smov 0   ;;  %s1144_s26 = smov 0  }
   0x9 LB: > { %s804_s27 = sadd.s32 4294967295, %s1075_s26   ;;  %s805_s28 = sadd.s32 4294967294, %s1075_s26   ;;  %s1075_s26 = sphi %s1144_s26, %s23_s26   ;;  %s1071_s25 = sphi %s1142_s25, %s1416_s25   ;;  %s1067_s24 = sphi %s1140_s24, %s1415_s24   ;;  %s1063_s23 = sphi %s1138_s23, %s1414_s23   ;;  %s1059_s22 = sphi %s1136_s22, %s1413_s22   ;;  %s1055_s21 = sphi %s1134_s21, %s1412_s21  }
   0xa   : > { %p57_p0 = scmp.ne.s32.totalorder %s1059_s22, %s1055_s21  ;;  %p1168_p1 = scmp.eq.s32.totalorder %s804_s27, 0 }
   0xb   : > { %p1172_p2 = scmp.eq.s32.totalorder %s804_s27, 1  ;;  %p192_p3 = scmp.eq.s32.totalorder %s805_s28, 1 }
   0xc   : > { %p1178_p4 = por %p1168_p1, %p57_p0  ;;  %p806_p5 = scmp.ge.s32.totalorder %s1075_s26, 1 }
   0xd   : > { %p1183_p6 = por %p192_p3, %p57_p0  ;;  %p199_p7 = scmp.lt.s32.totalorder %s1075_s26, 3 }
   0xe   : > { %s1400_s7 = scalar_select %p1178_p4, 1, 0 }
   0xf   : > { %s1401_s8 = scalar_select %p1183_p6, 1, 0 }
  0x10   : > { %p1188_p8 = pnand %p806_p5, %p199_p7  ;;  %s1077_s10 = smov [#allocation5]  }
  0x11   : > { %s212_s11 = sshll.u32 %s1077_s10, 4  ;;  %s35_s13 = sadd.s32 1, %s1071_s25  ;;  %s213_s11 = int_to_ptr.vmem [resolvable:$true] %s212_s11 }
  0x12   : > { %p841_p10 = pneg %p1188_p8  ;;  %s44_s14 = sadd.s32 1, %s1063_s23 }
  0x13   : > { %p37_p12 = scmp.ge.s32.totalorder %s35_s13, 2  ;;  %s948_s15 = scalar_lea.vmem %s213_s11, 64 }
  0x14   : > { %p1197_p11 = pnand %p841_p10, %p1168_p1  ;;  %p949_p0 = scmp.ne.s32.totalorder %s213_s11, %s948_s15 }
  0x15   : > { %p956_p7 = scmp.lt.s32.totalorder %s213_s11, %s213_s11  ;;  %p957_p6 = scmp.lt.s32.totalorder %s948_s15, %s948_s15 }
  0x16   : > { %p939_p13 = pneg %p1197_p11 }
  0x17   : > { %p958_p9 = por %p957_p6, %p956_p7 }
  0x18   : > { %p951_p3 = pnand %p949_p0, %p939_p13 }
  0x1a   : > { %p952_p5 = pneg %p951_p3 }
  0x1c   : > { %p959_p4 = pnand %p958_p9, %p952_p5 }
  0x1e   : > { %962 = shalt.err (!%p959_p4)
}
  0x1f   : > { %s1404_s1 = sld [smem:[#allocation12_spill]]  ;;  %s1418_s13 = smov (%p37_p12, %s35_s13), 0 }
  0x20   : > { %1405 = sst [smem:[#allocation11_spill]] %s1418_s13  ;;  %p51_p6 = scmp.ne.s32.totalorder %s1063_s23, %s1059_s22 }
  0x21   : > { %p52_p4 = scmp.eq.s32.totalorder %s1075_s26, 0  ;;  %s39_s18 = ssub.s32 %s1071_s25, %s1418_s13 }
  0x22   : > { %p854_p9 = scmp.lt.s32.totalorder %s1075_s26, 2  ;;  %p42_p10 = scmp.eq.s32.totalorder %s39_s18, 0 }
  0x23   : > { %p53_p13 = por %p52_p4, %p51_p6  ;;  %p1220_p0 = por %p1172_p2, %p51_p6 }
  0x24   : > { %s235_s20 = sand.u32 1, %s1063_s23   ;;  %s831_s10 = sshll.u32 %s1071_s25, 7 }
  0x25   : > { %844 = dma.hbm_to_vmem [thread:$0]  (!%p1197_p11), %s1404_s1, 64, %s213_s11, [#allocation6]  }
  0x26   : > { %s1226_s27 = scalar_select %p42_p10, %s1063_s23, %s44_s14  }
  0x27   : > { %s809_s28 = sshll.u32 %s235_s20, 3  ;;  %s247_s15 = scalar_lea.hbm %s1388_s0, %s831_s10 }
  0x28   : > { %s239_s16 = scalar_lea.vmem [#allocation2], %s809_s28  ;;  %p1232_p11 = pnand %p854_p9, %p53_p13 }
  0x29   : > { %s249_s17 = sshll.u32 %s239_s16, 4  ;;  %s236_s30 = scalar_lea.sflag [#allocation3], %s235_s20  ;;  %s250_s17 = int_to_ptr.vmem [resolvable:$true] %s249_s17 }
  0x2a   : > { %p965_p2 = pneg %p1232_p11  ;;  %s976_s1 = scalar_lea.vmem %s250_s17, 128 }
  0x2b   : > { %p977_p12 = scmp.ne.s32.totalorder %s250_s17, %s976_s1  ;;  %s1078_s14 = smov [#allocation2]  }
  0x2c   : > { %s981_s13 = sshll.u32 %s1078_s14, 4  ;;  %s982_s13 = int_to_ptr.vmem [resolvable:$false] %s981_s13 }
  0x2d   : > { %p979_p3 = pnand %p977_p12, %p965_p2  ;;  %s983_s11 = scalar_lea.vmem %s982_s13, 256 }
  0x2e   : > { %p984_p7 = scmp.lt.s32.totalorder %s250_s17, %s982_s13  ;;  %p985_p6 = scmp.lt.s32.totalorder %s983_s11, %s976_s1 }
  0x2f   : > { %p980_p5 = pneg %p979_p3 }
  0x30   : > { %p986_p4 = por %p985_p6, %p984_p7 }
  0x32   : > { %p987_p10 = pnand %p986_p4, %p980_p5 }
  0x34   : > { %990 = shalt.err (!%p987_p10)
}
  0x35   : > { %848 = dma.hbm_to_vmem [thread:$0]  (!%p1232_p11), %s247_s15, 128, %s250_s17, %s236_s30  }
  0x36   : > { %258 = sbr.rel (%p1188_p8) target bundleno = 479 (0x1df), region = 44  ;;  %s1243_s20 = sand.u32 (!%p1188_p8), 1, %s1059_s22  }
  0x37   : > { %s813_s28 = sshll.u32 (!%p1188_p8), %s1243_s20, 3  ;;  %s261_s10 = scalar_lea.sflag (!%p1188_p8), [#allocation3], %s1243_s20 }
  0x38   : > { %s264_s12 = scalar_lea.vmem (!%p1188_p8), [#allocation2], %s813_s28  ;;  %p1408_p9 = scmp.ne.s32.totalorder (!%p1188_p8), %s1400_s7, 0 }
  0x3b   : > { %1042 = dma.done.wait (%p1408_p9), %s261_s10, 128  }
  0x3c   : > { %1044 = vsyncadd (%p1408_p9), %s261_s10, 4294967168 }
  0x3d   : > { %1046 = dma.done.wait (%p1168_p1), [#allocation6], 64  }
  0x3e   : > { %1048 = vsyncadd (%p1168_p1), [#allocation6], 4294967232  ;;  %v1079_v0 = vmov 0   ;;  %v1080_v1 = vmov 4   ;;  %v300_v2 = vld [vmem:[#allocation5] sm:$0xf]  ;;  %v313_v22 = vlaneseq }
  0x3f   : > { %927 = vset.pattern.permute.xlu1 %v1079_v0  ;;  %925 = vset.pattern.permute.xlu0 %v1080_v1  ;;  %v1255_v3 = vld [vmem:[%s264_s12] sm:$0xff]  ;;  %s1081_s7 = smov 17   ;;  %v1082_v6 = vmov 1   ;;  %s1083_s29 = smov 16   ;;  %v1084_v7 = vmov 2   ;;  %v1085_v8 = vmov 3  }
  0x40   : > { %359 = vperm.xlu1 %927, %v300_v2   ;;  %308 = vperm.xlu0 %925, %v300_v2   ;;  %v302_v4 = vld [vmem:[%s1390_s2] sm:$0xf]  ;;  %v333_v5 = vcombine.high %v1255_v3, %v1255_v3  ;;  %s1086_s13 = smov 15   ;;  %v1087_v9 = vmov 5   ;;  %s1088_s15 = smov 1   ;;  %v1089_v10 = vmov 6  }
  0x41   : > { %v1090_v11 = vmov 7   ;;  %s1091_s16 = smov 127   ;;  %v1092_v12 = vmov 8   ;;  %s1093_s17 = smov 113   ;;  %v1096_v13 = vmov 0.0   ;;  %v602_v14 = vld [vmem:[%s1392_s4] sm:$0xff] }
  0x42   : > { %s1094_s18 = smov 112   ;;  %s1095_s30 = smov 111   ;;  %683 = vmatprep.mubr.f32.mxu0 %v1096_v13  ;;  %v1097_v25 = vmov 839922192   ;;  %v314_v27 = vshrl.u32 %v313_v22, 7  ;;  %v1273_v29 = vand.u32 127, %v313_v22 }
  0x43   : > { %v311_v26 = vunpack.c.l.s4 %v1097_v25  ;;  %v344_v35 = vld [vmem:[%s1393_s5] ss:$8 sm:$0x3]  ;;  %v816_v40 = vld [vmem:[%s1393_s5 + $0x1] ss:$8 sm:$0x3] }
  0x44   : > { %926 = vset.pattern.permute.xlu0 %v1079_v0  ;;  %335 = vrot.lane.b32.xlu1 %v1255_v3, %s1081_s7  ;;  %v1275_v32 = vsub.s32 0, %v314_v27  ;;  %v1277_v33 = vsub.s32 1, %v314_v27  ;;  %vm341_vm0 = vcmp.lt.s32.totalorder %v1273_v29, 17  ;;  %vm373_vm1 = vcmp.lt.s32.totalorder %v1273_v29, 16  ;;  %s815_s1 = sshll.u32 %s1243_s20, 4  ;;  %s832_s9 = sshll.u32 %s1067_s24, 8 }
  0x45   : > { %321 = vperm.xlu0 %926, %v302_v4   ;;  %v312_v30 = vunpack.c.0.s8 %v311_v26  ;;  %v817_v44 = vld [vmem:[%s1393_s5 + $0x2] ss:$8 sm:$0x3]  ;;  %v818_v45 = vld [vmem:[%s1393_s5 + $0x3] ss:$8 sm:$0x3] }
  0x46   : > { %v349_v38 = vrot.slane %v344_v35, %v1275_v32  ;;  %v353_v39 = vrot.slane %v344_v35, %v1277_v33  ;;  %v382_v47 = vrot.slane %v816_v40, %v1275_v32  ;;  %v386_v48 = vrot.slane %v816_v40, %v1277_v33  ;;  %v819_v54 = vld [vmem:[%s1393_s5 + $0x5] ss:$8 sm:$0x3]  ;;  %v820_v4 = vld [vmem:[%s1393_s5 + $0x6] ss:$8 sm:$0x3] }
  0x47   : > { %v315_v36 = vsub.s32 %v312_v30, %v314_v27  ;;  %vm406_vm2 = vcmp.lt.s32.totalorder %v1273_v29, 15  ;;  %v415_v56 = vrot.slane %v817_v44, %v1275_v32  ;;  %v419_v57 = vrot.slane %v817_v44, %v1277_v33 }
  0x48   : > { %337 = vrot.lane.b32.xlu1 %v333_v5, %s1081_s7  ;;  %vm439_vm3 = vcmp.lt.s32.totalorder %v1273_v29, 1  ;;  %v448_v58 = vrot.slane %v818_v45, %v1275_v32  ;;  %v452_v61 = vrot.slane %v818_v45, %v1277_v33  ;;  %vm472_vm4 = vcmp.lt.s32.totalorder %v1273_v29, 127  ;;  %s296_s7 = scalar_lea.vmem [#allocation7], %s815_s1 }
  0x49   : > { %928 = vset.pattern.permute.xlu0 %v1082_v6  ;;  %v481_v1 = vrot.slane %v819_v54, %v1275_v32  ;;  %vm505_vm5 = vcmp.lt.s32.totalorder %v1273_v29, 113  ;;  %vm538_vm6 = vcmp.lt.s32.totalorder %v1273_v29, 112  ;;  %vm571_vm7 = vcmp.lt.s32.totalorder %v1273_v29, 111 }
  0x4a   : > { %392 = vperm.xlu0 %928, %v300_v2   ;;  %vm614_vm8 = vcmask 1043456   ;;  %vm610_vm9 = vcmask 31744  }
  0x4c   : > { %369 = vrot.lane.b32.xlu1 %v1255_v3, %s1083_s29 }
  0x4e   : > { %929 = vset.pattern.permute.xlu0 %v1084_v7 }
  0x4f   : > { %425 = vperm.xlu0 %929, %v300_v2  }
  0x50   : > { %371 = vrot.lane.b32.xlu1 %v333_v5, %s1083_s29  ;;  %s707_s29 = sshll.u32 %s296_s7, 4  ;;  %s708_s29 = int_to_ptr.vmem [resolvable:$true] %s707_s29 }
  0x53   : > { %930 = vset.pattern.permute.xlu0 %v1085_v8 }
  0x54   : > { %402 = vrot.lane.b32.xlu1 %v1255_v3, %s1086_s13  ;;  %458 = vperm.xlu0 %930, %v300_v2  }
  0x58   : > { %404 = vrot.lane.b32.xlu1 %v333_v5, %s1086_s13  ;;  %931 = vset.pattern.permute.xlu0 %v1087_v9 }
  0x59   : > { %491 = vperm.xlu0 %931, %v300_v2  }
  0x5c   : > { %435 = vrot.lane.b32.xlu1 %v1255_v3, %s1088_s15 }
  0x5d   : > { %932 = vset.pattern.permute.xlu0 %v1089_v10 }
  0x5e   : > { %524 = vperm.xlu0 %932, %v300_v2  }
  0x60   : > { %437 = vrot.lane.b32.xlu1 %v333_v5, %s1088_s15 }
  0x62   : > { %933 = vset.pattern.permute.xlu0 %v1090_v11 }
  0x63   : > { %557 = vperm.xlu0 %933, %v300_v2  }
  0x64   : > { %468 = vrot.lane.b32.xlu1 %v1255_v3, %s1091_s16 }
  0x67   : > { %934 = vset.pattern.permute.xlu0 %v1092_v12 }
  0x68   : > { %470 = vrot.lane.b32.xlu1 %v333_v5, %s1091_s16  ;;  %590 = vperm.xlu0 %934, %v300_v2   ;;  %v485_v2 = vrot.slane %v819_v54, %v1277_v33  ;;  %s705_s16 = scalar_lea.hbm %s1394_s6, %s832_s9 }
  0x6c   : > { %501 = vrot.lane.b32.xlu1 %v1255_v3, %s1093_s17  ;;  %935 = vset.pattern.permute.xlu0 %v1079_v0 }
  0x6d   : > { %605 = vperm.xlu0 %935, %v602_v14   ;;  %v514_v14 = vrot.slane %v820_v4, %v1275_v32 }
  0x70   : > { %503 = vrot.lane.b32.xlu1 %v333_v5, %s1093_s17  ;;  %s693_s17 = scalar_lea.sflag [#allocation4], %s1243_s20 }
  0x74   : > { %534 = vrot.lane.b32.xlu1 %v1255_v3, %s1094_s18 }
  0x78   : > { %536 = vrot.lane.b32.xlu1 %v333_v5, %s1094_s18  ;;  %s991_s18 = scalar_lea.vmem %s708_s29, 256 }
  0x79   : > { %p992_p1 = scmp.ne.s32.totalorder %s708_s29, %s991_s18 }
  0x7b   : > { %p993_p8 = pnand %p992_p1, %p1220_p0 }
  0x7c   : > { %567 = vrot.lane.b32.xlu1 %v1255_v3, %s1095_s30 }
  0x7d   : > { %p994_p13 = pneg %p993_p8 }
  0x80   : > { %569 = vrot.lane.b32.xlu1 %v333_v5, %s1095_s30  ;;  %s1098_s30 = smov [#allocation7]  }
  0x81   : > { %s995_s24 = sshll.u32 %s1098_s30, 4  ;;  %s996_s24 = int_to_ptr.vmem [resolvable:$false] %s995_s24 }
  0x82   : > { %s997_s14 = scalar_lea.vmem %s996_s24, 512  ;;  %p998_p11 = scmp.lt.s32.totalorder %s708_s29, %s996_s24 }
  0x83   : > { %p999_p2 = scmp.lt.s32.totalorder %s997_s14, %s991_s18 }
  0x85   : > { %p1000_p12 = por %p999_p2, %p998_p11 }
  0x87   : > { %p1001_p3 = pnand %p1000_p12, %p994_p13 }
  0xbb   : > { %v360_v15 = vpop.permute.xlu1 %359  ;;  %v309_v24 = vpop.permute.xlu0 %308 }
  0xbc   : > { %v316_v46 = vrot.slane %v309_v24, %v315_v36 }
  0xbe   : > { %v318_v5 = vmul.f32 %v316_v46, %v1255_v3 }
  0xbf   : > { %v336_v16 = vpop.permute.xlu1 %335 }
  0xc0   : > { %v322_v31 = vpop.permute.xlu0 %321 }
  0xc1   : > { %v329_v8 = vrot.slane %v322_v31, %v315_v36 }
  0xc3   : > { %v338_v17 = vpop.permute.xlu1 %337 }
  0xc4   : > { %v342_v42 = vsel %vm341_vm0, %v336_v16, %v338_v17  ;;  %v343_v43 = vsel %vm341_vm0, %v338_v17, %v336_v16  ;;  %v518_v16 = vrot.slane %v820_v4, %v1277_v33 }
  0xc5   : > { %v393_v37 = vpop.permute.xlu0 %392  ;;  %v356_v50 = vmul.f32 %v349_v38, %v343_v43  ;;  %v357_v51 = vmul.f32 %v353_v39, %v342_v42 }
  0xc7   : > { %v370_v18 = vpop.permute.xlu1 %369  ;;  %v362_v6 = vmul.f32 %v360_v15, %v356_v50  ;;  %v363_v7 = vmul.f32 %v360_v15, %v357_v51 }
  0xc9   : > { %v366_v22 = vcombine.low %v362_v6, %v363_v7 }
  0xca   : > { %v426_v49 = vpop.permute.xlu0 %425 }
  0xcb   : > { %v372_v19 = vpop.permute.xlu1 %371 }
  0xcc   : > { %v374_v52 = vsel %vm373_vm1, %v370_v18, %v372_v19  ;;  %v375_v53 = vsel %vm373_vm1, %v372_v19, %v370_v18 }
  0xcd   : > { %v389_v62 = vmul.f32 %v382_v47, %v375_v53  ;;  %v390_v63 = vmul.f32 %v386_v48, %v374_v52  ;;  %v822_v52 = vld [vmem:[%s1393_s5 + $0x10] ss:$8 sm:$0x3] }
  0xcf   : > { %v403_v20 = vpop.permute.xlu1 %402  ;;  %v459_v0 = vpop.permute.xlu0 %458  ;;  %v395_v3 = vmul.f32 %v393_v37, %v389_v62  ;;  %v396_v15 = vmul.f32 %v393_v37, %v390_v63 }
  0xd1   : > { %v399_v37 = vcombine.low %v395_v3, %v396_v15 }
  0xd3   : > { %v405_v21 = vpop.permute.xlu1 %404 }
  0xd4   : > { %v407_v59 = vsel %vm406_vm2, %v403_v20, %v405_v21  ;;  %v408_v60 = vsel %vm406_vm2, %v405_v21, %v403_v20  ;;  %v492_v19 = vpop.permute.xlu0 %491  ;;  %v821_v20 = vld [vmem:[%s1393_s5 + $0x7] ss:$8 sm:$0x3]  ;;  %v331_v21 = vadd.f32 %v329_v8, %v318_v5 }
  0xd5   : > { %v422_v10 = vmul.f32 %v415_v56, %v408_v60  ;;  %v423_v11 = vmul.f32 %v419_v57, %v407_v59  ;;  %v547_v35 = vrot.slane %v821_v20, %v1275_v32  ;;  %v551_v36 = vrot.slane %v821_v20, %v1277_v33 }
  0xd6   : > { %v368_v44 = vadd.f32 %v366_v22, %v331_v21  ;;  %v580_v59 = vrot.slane %v822_v52, %v1275_v32  ;;  %v584_v60 = vrot.slane %v822_v52, %v1277_v33 }
  0xd7   : > { %v436_v23 = vpop.permute.xlu1 %435  ;;  %v428_v26 = vmul.f32 %v426_v49, %v422_v10  ;;  %v429_v27 = vmul.f32 %v426_v49, %v423_v11 }
  0xd8   : > { %v401_v54 = vadd.f32 %v399_v37, %v368_v44 }
  0xd9   : > { %v525_v38 = vpop.permute.xlu0 %524  ;;  %v432_v45 = vcombine.low %v428_v26, %v429_v27 }
  0xdb   : > { %v438_v28 = vpop.permute.xlu1 %437 }
  0xdc   : > { %v440_v12 = vsel %vm439_vm3, %v436_v23, %v438_v28  ;;  %v441_v13 = vsel %vm439_vm3, %v438_v28, %v436_v23 }
  0xdd   : > { %v455_v23 = vmul.f32 %v448_v58, %v441_v13  ;;  %v456_v24 = vmul.f32 %v452_v61, %v440_v12  ;;  %v434_v61 = vadd.f32 %v432_v45, %v401_v54 }
  0xde   : > { %v558_v53 = vpop.permute.xlu0 %557 }
  0xdf   : > { %v469_v34 = vpop.permute.xlu1 %468  ;;  %v461_v39 = vmul.f32 %v459_v0, %v455_v23  ;;  %v462_v40 = vmul.f32 %v459_v0, %v456_v24 }
  0xe3   : > { %v471_v41 = vpop.permute.xlu1 %470  ;;  %v591_v7 = vpop.permute.xlu0 %590 }
  0xe4   : > { %v473_v17 = vsel %vm472_vm4, %v469_v34, %v471_v41  ;;  %v474_v18 = vsel %vm472_vm4, %v471_v41, %v469_v34 }
  0xe5   : > { %v488_v31 = vmul.f32 %v481_v1, %v473_v17  ;;  %v489_v34 = vmul.f32 %v485_v2, %v474_v18  ;;  %v305_v17 = vld [vmem:[%s1391_s3] sm:$0xff] }
  0xe7   : > { %v502_v55 = vpop.permute.xlu1 %501  ;;  %v494_v48 = vmul.f32 %v492_v19, %v488_v31  ;;  %v495_v49 = vmul.f32 %v492_v19, %v489_v34 }
  0xe8   : > { %v606_v18 = vpop.permute.xlu0 %605 }
  0xe9   : > { %v498_v62 = vcombine.low %v494_v48, %v495_v49 }
  0xeb   : > { %v504_v9 = vpop.permute.xlu1 %503 }
  0xec   : > { %v506_v28 = vsel %vm505_vm5, %v502_v55, %v504_v9  ;;  %v507_v30 = vsel %vm505_vm5, %v504_v9, %v502_v55  ;;  %v465_v55 = vcombine.low %v461_v39, %v462_v40 }
  0xed   : > { %v521_v41 = vmul.f32 %v514_v14, %v506_v28  ;;  %v522_v42 = vmul.f32 %v518_v16, %v507_v30 }
  0xee   : > { %v467_v1 = vadd.f32 %v465_v55, %v434_v61 }
  0xef   : > { %v535_v25 = vpop.permute.xlu1 %534  ;;  %v527_v56 = vmul.f32 %v525_v38, %v521_v41  ;;  %v528_v57 = vmul.f32 %v525_v38, %v522_v42 }
  0xf0   : > { %v500_v8 = vadd.f32 %v498_v62, %v467_v1 }
  0xf1   : > { %v531_v2 = vcombine.low %v527_v56, %v528_v57 }
  0xf3   : > { %v537_v43 = vpop.permute.xlu1 %536  ;;  %v533_v29 = vadd.f32 %v531_v2, %v500_v8 }
  0xf4   : > { %v539_v46 = vsel %vm538_vm6, %v535_v25, %v537_v43  ;;  %v540_v47 = vsel %vm538_vm6, %v537_v43, %v535_v25 }
  0xf5   : > { %v554_v50 = vmul.f32 %v547_v35, %v539_v46  ;;  %v555_v51 = vmul.f32 %v551_v36, %v540_v47 }
  0xf7   : > { %v568_v58 = vpop.permute.xlu1 %567  ;;  %v560_v63 = vmul.f32 %v558_v53, %v554_v50  ;;  %v561_v0 = vmul.f32 %v558_v53, %v555_v51 }
  0xf9   : > { %v564_v9 = vcombine.low %v560_v63, %v561_v0 }
  0xfb   : > { %v570_v4 = vpop.permute.xlu1 %569  ;;  %v566_v33 = vadd.f32 %v564_v9, %v533_v29 }
  0xfc   : > { %v572_v5 = vsel %vm571_vm7, %v568_v58, %v570_v4  ;;  %v573_v6 = vsel %vm571_vm7, %v570_v4, %v568_v58 }
  0xfd   : > { %v587_v10 = vmul.f32 %v580_v59, %v572_v5  ;;  %v588_v11 = vmul.f32 %v584_v60, %v573_v6 }
  0xff   : > { %v593_v12 = vmul.f32 %v591_v7, %v587_v10  ;;  %v594_v32 = vmul.f32 %v591_v7, %v588_v11 }
 0x101   : > { %v597_v13 = vcombine.low %v593_v12, %v594_v32 }
 0x103   : > { %v599_v14 = vadd.f32 %v597_v13, %v566_v33 }
 0x105   : > { %v600_v16 = vmax.f32 %v599_v14, 0.0 }
 0x107   : > { %v601_v3 = vmin.f32 %v600_v16, 6.0 }
 0x109   : > { %v609_v15 = vcombine.high %v601_v3, %v601_v3 }
 0x10b   : > { %823 = vmatprep.subr.msk.mxu0 %vm614_vm8, %v609_v15 }
 0x10c   : > { %824 = vmatpush1.msk.msra.mxu0 %vm614_vm8, %v601_v3 }
 0x10d   : > { %825 = vmatmul.mubr.msk.f32.vlgmr.msra.gmra.mxu0 %vm610_vm9, %v305_v17 }
 0x1cd   : > { %v685_v19 = vpop.f32.mrf.mxu0 }
 0x1ce   : > { %v686_v20 = vadd.f32 %v685_v19, %v606_v18 }
 0x1cf   : > { %v687_v21 = vpop.f32.mrf.mxu0 }
 0x1d0   : > { %690 = vst [vmem:[%s296_s7] sm:$0xff] %v686_v20  ;;  %v688_v22 = vadd.f32 %v687_v21, %v606_v18 }
 0x1d2   : > { %691 = vst [vmem:[%s296_s7 + $0x8] sm:$0xff] %v688_v22 }
 0x1d3   : > { %1004 = shalt.err (!%p1001_p3)
}
 0x1d4   : > { %s1005_s11 = scalar_lea.hbm %s705_s16, 256  ;;  %s1009_s10 = scalar_lea.hbm %s1394_s6, 512 }
 0x1d5   : > { %p1006_p5 = scmp.ne.s32.totalorder %s705_s16, %s1005_s11  ;;  %p1010_p4 = scmp.lt.s32.totalorder %s705_s16, %s1394_s6 }
 0x1d6   : > { %p1011_p10 = scmp.lt.s32.totalorder %s1009_s10, %s1005_s11 }
 0x1d7   : > { %p1007_p7 = pnand %p1006_p5, %p1220_p0 }
 0x1d8   : > { %p1012_p9 = por %p1011_p10, %p1010_p4 }
 0x1d9   : > { %p1008_p6 = pneg %p1007_p7 }
 0x1db   : > { %p1013_p1 = pnand %p1012_p9, %p1008_p6 }
 0x1dd   : > { %1016 = shalt.err (!%p1013_p1)
}
 0x1de   : > { %839 = dma.vmem_to_hbm [thread:$0]  (%p1220_p0), %s708_s29, 256, %s705_s16, %s693_s17  }
 0x1df PF: > { %s719_s9 = sand.u32 1, %s1055_s21   ;;  %p1409_p8 = scmp.ne.s32.totalorder %s1401_s8, 0 }
 0x1e0   : > { %p1410_p13 = scmp.ge.s32.totalorder %s1075_s26, 2  ;;  %s720_s7 = scalar_lea.sflag [#allocation4], %s719_s9 }
 0x1e2   : > { %p850_p11 = pnand %p1410_p13, %p1409_p8 }
 0x1e4   : > { %p851_p2 = pneg %p850_p11 }
 0x1e6   : > { %1050 = dma.done.wait (%p851_p2), %s720_s7, 256  }
 0x1e7   : > { %1052 = vsyncadd (%p851_p2), %s720_s7, 4294967040  ;;  %s23_s26 = sadd.s32 1, %s1075_s26   ;;  %s1411_s19 = sld [smem:[#allocation11_spill]] }
 0x1e8   : > { %p20_p12 = scmp.ge.s32.totalorder %s23_s26, 4   ;;  %s1412_s21 = smov %s1059_s22 }
 0x1e9   : > { %s1413_s22 = smov %s1063_s23  ;;  %s1414_s23 = smov %s1226_s27 }
 0x1ea   : > { %s1415_s24 = smov %s1071_s25  ;;  %22 = sbr.rel (!%p20_p12) target bundleno = 9 (0x9), region = 103 }
 0x1ed   : > { %s1416_s25 = smov %s1411_s19 }
 0x1ef   :  { %725 = vsyncpa [#allocation3], 1 }
 0x1f0   :  { %727 = vsyncpa [#allocation3 + $0x1], 1 }
 0x1f1   :  { %728 = vsyncpa [#allocation6], 1 }
 0x1f2   :  { %729 = vsyncpa [#allocation4], 1 }
 0x1f3   :  { %731 = vsyncpa [#allocation4 + $0x1], 1 }

</bundles_post_ra>
